<compile_context>
chip_gen: v7x
topology: tpu7x:2x2x1
jax: 0.10.0
libtpu: 0.0.40
codegen_flags: <defaults>
</compile_context>

<pallas_src>
import functools

import jax
import jax.numpy as jnp
from jax.experimental import pallas as pl
from jax.experimental.pallas import tpu as pltpu

_NEG_LARGE = -1e30  # lane padding value: inert for row-max and exp-sum


def _round_up(x: int, m: int) -> int:
    return (x + m - 1) // m * m


def _focal_loss_kernel(logits_ref, target_ref, out_ref, *,
                       gamma: float, n_valid: int, tile_n: int,
                       mask_rows: bool):
    # logits_ref: [TILE_N, C_PAD] float  (VMEM)
    # target_ref: [TILE_N, 1] int32      (VMEM)
    # out_ref:    [1, 1] f32             (SMEM) -- per-tile partial sum
    i = pl.program_id(0)

    logits = logits_ref[...].astype(jnp.float32)               # [T, C]
    tgt = target_ref[...]                                      # [T, 1] int32
    tn, c = logits.shape

    col = jax.lax.broadcasted_iota(jnp.int32, (tn, c), 1)      # [T, C]
    is_tgt = col == tgt                                        # [T, C] bool

    # Numerically-stable log-sum-exp and target-logit gather (select+reduce).
    m = jnp.max(logits, axis=-1, keepdims=True)                # [T, 1] (XLU)
    e = jnp.exp(logits - m)                                    # [T, C] (EUP)
    s = jnp.sum(e, axis=-1, keepdims=True)                     # [T, 1] (XLU)
    tgt_logit = jnp.sum(jnp.where(is_tgt, logits, 0.0),
                        axis=-1, keepdims=True)                # [T, 1] (XLU)

    ce = jnp.log(s) + m - tgt_logit                            # cross entropy
    p = jnp.exp(-ce)                                           # == torch exp(-CE)
    one_minus_p = 1.0 - p

    if gamma == 0.0:
        factor = jnp.ones_like(one_minus_p)
    elif gamma == 1.0:
        factor = one_minus_p
    elif gamma == 2.0:
        factor = one_minus_p * one_minus_p
    else:
        # (1 - p) ** gamma via exp(gamma * log(1 - p)).
        # Guard: if rounding makes 1 - p <= 0 we emit 0 (PyTorch would give
        # NaN / a tiny negative for p > 1); the 1e-30 clamp only biases the
        # pow for astronomically small 1 - p. Intentional, documented.
        factor = jnp.where(
            one_minus_p > 0.0,
            jnp.exp(gamma * jnp.log(jnp.maximum(one_minus_p, 1e-30))),
            jnp.zeros_like(one_minus_p),
        )

    loss = factor * ce                                         # [T, 1]
    if mask_rows:
        # Only the case where N was rounded up to a tile multiple.
        row = jax.lax.broadcasted_iota(jnp.int32, (tn, 1), 0) + i * tile_n
        loss = jnp.where(row < n_valid, loss, 0.0)

    out_ref[0, 0] = jnp.sum(loss)


def focal_loss(logits, target, *, gamma: float = 1.0, tile_n: int | None = None,
               tile_budget_bytes: int = 2 * 1024 * 1024):
    """Pallas TPU focal loss. logits: [N, C] float (f32 or bf16), target: [N] int."""
    n, c = logits.shape

    c_pad = _round_up(c, 128)                       # lane-dense class axis
    itemsize = jnp.dtype(logits.dtype).itemsize

    # Rows per grid step: as large as fits the per-buffer VMEM budget
    # (double-buffered by BlockSpec), rounded to a multiple of 8.
    max_rows = max(8, (tile_budget_bytes // (c_pad * itemsize)) // 8 * 8)
    if tile_n is None:
        tile_n = max_rows
    tn = min(max(8, (tile_n // 8) * 8), max_rows, _round_up(n, 8))
    n_pad = _round_up(n, tn)
    num_tiles = n_pad // tn

    logits_p = logits
    if c_pad != c:                                  # padded classes: -1e30 (inert)
        logits_p = jnp.pad(logits_p, ((0, 0), (0, c_pad - c)),
                           constant_values=_NEG_LARGE)
    if n_pad != n:                                  # padded rows: zeros (masked out)
        logits_p = jnp.pad(logits_p, ((0, n_pad - n), (0, 0)))

    tgt2d = target.astype(jnp.int32).reshape(n, 1)
    if n_pad != n:
        tgt2d = jnp.pad(tgt2d, ((0, n_pad - n), (0, 0)))

    partial = pl.pallas_call(
        functools.partial(_focal_loss_kernel, gamma=float(gamma),
                          n_valid=n, tile_n=tn, mask_rows=(n_pad != n)),
        out_shape=jax.ShapeDtypeStruct((num_tiles, 1), jnp.float32),
        grid=(num_tiles,),
        in_specs=[
            pl.BlockSpec((tn, c_pad), lambda i: (i, 0)),
            pl.BlockSpec((tn, 1), lambda i: (i, 0)),
        ],
        out_specs=pl.BlockSpec((1, 1), lambda i: (i, 0),
                               memory_space=pltpu.MemorySpace.SMEM),
        compiler_params=pltpu.CompilerParams(
            dimension_semantics=("parallel",)),
    )(logits_p, tgt2d)

    # Tiny final reduction over per-tile partial sums (outside the kernel so
    # the grid axis stays parallel / megacore-shardable).
    return jnp.sum(partial)


def _focal_loss_ref(logits, target, gamma=1.0):
    """Plain-JAX reference for correctness checking."""
    logits = logits.astype(jnp.float32)
    lse = jax.scipy.special.logsumexp(logits, axis=-1)
    tgt_logit = jnp.take_along_axis(logits, target[:, None], axis=-1)[:, 0]
    ce = lse - tgt_logit
    p = jnp.exp(-ce)
    return jnp.sum((1.0 - p) ** gamma * ce)


if __name__ == "__main__":
    key = jax.random.PRNGKey(0)

    # Case 1: FocalLoss(gamma=1.0, num_classes=80): input [N, 81], target [N].
    N1, C, G1 = 16, 81, 1.0
    k1, k2, k3, k4, k5, k6 = jax.random.split(key, 6)
    logits1 = jax.random.normal(k1, (N1, C), dtype=jnp.float32)
    target1 = jax.random.randint(k2, (N1,), 0, C, dtype=jnp.int32)
    out1 = jax.block_until_ready(focal_loss(logits1, target1, gamma=G1))
    ref1 = _focal_loss_ref(logits1, target1, gamma=G1)
    assert jnp.allclose(out1, ref1, rtol=1e-5, atol=1e-5), (out1, ref1)

    # Case 2: multi-tile grid (forced small tile) with row padding, gamma=2 path.
    N2, G2 = 600, 2.0
    logits2 = jax.random.normal(k3, (N2, C), dtype=jnp.float32)
    target2 = jax.random.randint(k4, (N2,), 0, C, dtype=jnp.int32)
    out2 = jax.block_until_ready(focal_loss(logits2, target2, gamma=G2,
                                            tile_n=256))
    ref2 = _focal_loss_ref(logits2, target2, gamma=G2)
    assert jnp.allclose(out2, ref2, rtol=1e-4, atol=1e-4), (out2, ref2)

    # Case 3: fractional gamma (general exp/log pow path).
    N3, G3 = 64, 1.5
    logits3 = jax.random.normal(k5, (N3, C), dtype=jnp.float32)
    target3 = jax.random.randint(k6, (N3,), 0, C, dtype=jnp.int32)
    out3 = jax.block_until_ready(focal_loss(logits3, target3, gamma=G3))
    ref3 = _focal_loss_ref(logits3, target3, gamma=G3)
    assert jnp.allclose(out3, ref3, rtol=1e-4, atol=1e-4), (out3, ref3)

    print("KERNEL_OK")
</pallas_src>

<mosaic_0001>
module attributes {stable_mosaic.version = 11 : i64} {
  func.func @_focal_loss_kernel(%arg0: i32, %arg1: memref<16x128xf32, #tpu.memory_space<vmem>>, %arg2: memref<16x1xi32, #tpu.memory_space<vmem>>, %arg3: memref<1x1xf32, #tpu.memory_space<smem>>) attributes {dimension_semantics = [#tpu.dimension_semantics<parallel>], iteration_bounds = array<i64: 1>, scalar_prefetch = 0 : i64, scratch_operands = 0 : i64, tpu.core_type = #tpu.core_type<tc>, window_params = [{transform_indices = @transform_0, window_bounds = array<i64: 16, 128>}, {transform_indices = @transform_1, window_bounds = array<i64: 16, 1>}, {transform_indices = @transform_2, window_bounds = array<i64: 1, 1>}]} {
    %c0 = arith.constant 0 : index
    %c0_0 = arith.constant 0 : index
    %0 = vector.load %arg1[%c0, %c0_0] : memref<16x128xf32, #tpu.memory_space<vmem>>, vector<16x128xf32>
    %c0_1 = arith.constant 0 : index
    %c0_2 = arith.constant 0 : index
    %1 = vector.load %arg2[%c0_1, %c0_2] : memref<16x1xi32, #tpu.memory_space<vmem>>, vector<16x1xi32>
    %2 = tpu.iota {dimensions = array<i32: 1>} : vector<16x128xi32>
    %3 = vector.broadcast %1 : vector<16x1xi32> to vector<16x128xi32>
    %4 = arith.cmpi eq, %2, %3 : vector<16x128xi32>
    %cst = arith.constant dense<0xFF800000> : vector<16xf32>
    %5 = vector.multi_reduction <maximumf>, %0, %cst [1] : vector<16x128xf32> to vector<16xf32>
    %6 = vector.shape_cast %5 : vector<16xf32> to vector<16x1xf32>
    %7 = vector.broadcast %6 : vector<16x1xf32> to vector<16x128xf32>
    %8 = arith.subf %0, %7 : vector<16x128xf32>
    %9 = math.exp %8 : vector<16x128xf32>
    %cst_3 = arith.constant dense<0.000000e+00> : vector<16xf32>
    %10 = vector.multi_reduction <add>, %9, %cst_3 [1] : vector<16x128xf32> to vector<16xf32>
    %11 = vector.shape_cast %10 : vector<16xf32> to vector<16x1xf32>
    %cst_4 = arith.constant 0.000000e+00 : f32
    %12 = vector.broadcast %cst_4 : f32 to vector<16x128xf32>
    %13 = arith.select %4, %0, %12 : vector<16x128xi1>, vector<16x128xf32>
    %cst_5 = arith.constant dense<0.000000e+00> : vector<16xf32>
    %14 = vector.multi_reduction <add>, %13, %cst_5 [1] : vector<16x128xf32> to vector<16xf32>
    %15 = vector.shape_cast %14 : vector<16xf32> to vector<16x1xf32>
    %16 = math.log %11 : vector<16x1xf32>
    %17 = arith.addf %16, %6 : vector<16x1xf32>
    %18 = arith.subf %17, %15 : vector<16x1xf32>
    %cst_6 = arith.constant 0.000000e+00 : f32
    %19 = vector.broadcast %cst_6 : f32 to vector<16x1xf32>
    %20 = arith.subf %19, %18 : vector<16x1xf32>
    %21 = math.exp %20 : vector<16x1xf32>
    %cst_7 = arith.constant 1.000000e+00 : f32
    %22 = vector.broadcast %cst_7 : f32 to vector<16x1xf32>
    %23 = arith.subf %22, %21 : vector<16x1xf32>
    %24 = arith.mulf %23, %18 : vector<16x1xf32>
    %25 = vector.shape_cast %24 : vector<16x1xf32> to vector<1x16x1xf32>
    %cst_8 = arith.constant dense<0.000000e+00> : vector<1xf32>
    %26 = vector.multi_reduction <add>, %25, %cst_8 [1, 2] : vector<1x16x1xf32> to vector<1xf32>
    %27 = vector.shape_cast %26 : vector<1xf32> to vector<1x1x1xf32>
    %28 = vector.extract %27[0, 0, 0] : f32 from vector<1x1x1xf32>
    %c0_9 = arith.constant 0 : index
    %c0_10 = arith.constant 0 : index
    %29 = memref.load %arg3[%c0_9, %c0_10] : memref<1x1xf32, #tpu.memory_space<smem>>
    memref.store %28, %arg3[%c0_9, %c0_10] : memref<1x1xf32, #tpu.memory_space<smem>>
    return
  }
  func.func @transform_0(%arg0: i32) -> (i32, i32) {
    %c0_i32 = arith.constant 0 : i32
    %c0_i32_0 = arith.constant 0 : i32
    return %arg0, %c0_i32 : i32, i32
  }
  func.func @transform_1(%arg0: i32) -> (i32, i32) {
    %c0_i32 = arith.constant 0 : i32
    %c0_i32_0 = arith.constant 0 : i32
    return %arg0, %c0_i32 : i32, i32
  }
  func.func @transform_2(%arg0: i32) -> (i32, i32) {
    %c0_i32 = arith.constant 0 : i32
    %c0_i32_0 = arith.constant 0 : i32
    return %arg0, %c0_i32 : i32, i32
  }
}

</mosaic_0001>

<bundles_post_ra>
// kernel: tpu_custom_call.1
= control target key start
LH: loop header
LB: loop body
LE: loop exit
PB: predicated region body
PF: predicated region fallthrough
CT: control target
= control target key end

     0   :  { %v122_v2 = vmov 0   ;;  %s163_s0 = inlined_call_operand.vmem [shape: f32[16,128], index: 0, kind: input, shape index: {}]   ;;  %s164_s1 = inlined_call_operand.vmem [shape: s32[16,1], index: 1, kind: input, shape index: {}]   ;;  %s165_s2 = inlined_call_operand.hbm [shape: f32[1,1], index: 2, kind: output, shape index: {}]  }
   0x1   :  { %v12_v0 = vld [vmem:[%s163_s0] sm:$0xff]  ;;  %96 = vset.pattern.permute.xlu1 %v122_v2 }
   0x2   :  { %v14_v1 = vld [vmem:[%s164_s1] sm:$0xff]  ;;  %26 = vmax.xlane.f32.xlu0 %v12_v0 }
   0x3   :  { %7 = vsyncpa [#allocation3], 0  ;;  %v13_v3 = vld [vmem:[%s163_s0 + $0x8] sm:$0xff]  ;;  %19 = vperm.xlu1 %96, %v14_v1   ;;  %97 = vset.pattern.permute.xlu0 %v122_v2  ;;  %v16_v10 = vlaneseq  ;;  %vm64_vm2 = vcmask 7168   ;;  %s110_s18 = scalar_lea.hbm %s165_s2, 16 }
   0x4   :  { %v15_v4 = vld [vmem:[%s164_s1 + $0x8] sm:$0xff]  ;;  %p111_p0 = scmp.ne.s32.totalorder %s165_s2, %s110_s18  ;;  %p114_p1 = scmp.lt.u32.totalorder %s110_s18, %s165_s2 }
   0x5   :  { %v17_v13 = vand.u32 127, %v16_v10 }
   0x6   :  { %28 = vmax.xlane.f32.xlu0 %v13_v3  ;;  %p116_p2 = pnand %p114_p1, %p111_p0 }
   0x7   :  { %22 = vperm.xlu1 %96, %v15_v4  }
  0x82   :  { %v20_v12 = vpop.permute.xlu1 %19 }
  0x83   :  { %vm24_vm0 = vcmp.eq.s32.totalorder %v17_v13, %v20_v12 }
  0x84   :  { %v40_v16 = vsel %vm24_vm0, %v12_v0, 0.0 }
  0x86   :  { %v23_v15 = vpop.permute.xlu1 %22 }
  0x87   :  { %vm25_vm1 = vcmp.eq.s32.totalorder %v17_v13, %v23_v15 }
  0x88   :  { %v41_v18 = vsel %vm25_vm1, %v13_v3, 0.0 }
  0x8f   :  { %v27_v5 = vpop.xlane.xlu0 %26 }
  0x90   :  { %v30_v6 = vsub.f32 %v12_v0, %v27_v5 }
  0x92   :  { %v32_v7 = vmul.f32 1.442695, %v30_v6 }
  0x93   :  { %v29_v8 = vpop.xlane.xlu0 %28 }
  0x94   :  { %98 = vpow2.f32 %v32_v7  ;;  %v31_v9 = vsub.f32 %v13_v3, %v29_v8 }
  0x96   :  { %v34_v11 = vmul.f32 1.442695, %v31_v9 }
  0x98   :  { %100 = vpow2.f32 %v34_v11 }
  0x9e   :  { %v99_v14 = vpop.eup %98 }
  0x9f   :  { %36 = vadd.xlane.f32.xlu0 %v99_v14 }
  0xa2   :  { %v101_v17 = vpop.eup %100 }
  0xa3   :  { %38 = vadd.xlane.f32.xlu1 %v101_v17  ;;  %42 = vadd.xlane.f32.xlu0 %v40_v16 }
  0xa7   :  { %44 = vadd.xlane.f32.xlu0 %v41_v18 }
 0x12c   :  { %v37_v19 = vpop.xlane.xlu0 %36 }
 0x12d   :  { %102 = vlog2.f32 %v37_v19 }
 0x130   :  { %v39_v20 = vpop.xlane.xlu1 %38  ;;  %v43_v23 = vpop.xlane.xlu0 %42 }
 0x131   :  { %104 = vlog2.f32 %v39_v20 }
 0x134   :  { %v45_v30 = vpop.xlane.xlu0 %44 }
 0x137   :  { %v103_v21 = vpop.eup %102 }
 0x138   :  { %v47_v22 = vmul.f32 0.6931472, %v103_v21 }
 0x13a   :  { %v50_v24 = vadd.f32 %v47_v22, %v27_v5 }
 0x13b   :  { %v105_v25 = vpop.eup %104 }
 0x13c   :  { %v49_v26 = vmul.f32 0.6931472, %v105_v25  ;;  %v52_v27 = vsub.f32 %v50_v24, %v43_v23 }
 0x13e   :  { %v54_v28 = vsub.f32 0.0, %v52_v27  ;;  %v51_v29 = vadd.f32 %v49_v26, %v29_v8 }
 0x140   :  { %v56_v31 = vmul.f32 1.442695, %v54_v28  ;;  %v53_v32 = vsub.f32 %v51_v29, %v45_v30 }
 0x142   :  { %106 = vpow2.f32 %v56_v31  ;;  %v55_v33 = vsub.f32 0.0, %v53_v32 }
 0x144   :  { %v58_v34 = vmul.f32 1.442695, %v55_v33 }
 0x146   :  { %108 = vpow2.f32 %v58_v34 }
 0x14c   :  { %v107_v35 = vpop.eup %106 }
 0x14d   :  { %v60_v36 = vsub.f32 1.0, %v107_v35 }
 0x14f   :  { %v62_v38 = vmul.f32 %v60_v36, %v52_v27 }
 0x150   :  { %v109_v37 = vpop.eup %108 }
 0x151   :  { %v61_v39 = vsub.f32 1.0, %v109_v37  ;;  %v65_v41 = vsel %vm64_vm2, %v62_v38, 0.0 }
 0x153   :  { %v63_v40 = vmul.f32 %v61_v39, %v53_v32 }
 0x155   :  { %v66_v42 = vsel %vm64_vm2, %v63_v40, 0.0 }
 0x156   :  { %v67_v43 = vadd.f32 %v66_v42, %v65_v41 }
 0x158   :  { %68 = vadd.xlane.f32.xlu0 %v67_v43 }
 0x1e5   :  { %v69_v44 = vpop.xlane.xlu0 %68 }
 0x1e6   :  { %v70_v45 = vrot.slane %v69_v44, 4 }
 0x1e8   :  { %v71_v46 = vadd.f32 %v70_v45, %v69_v44 }
 0x1ea   :  { %v72_v47 = vrot.slane %v71_v46, 2 }
 0x1ec   :  { %v73_v48 = vadd.f32 %v72_v47, %v71_v46 }
 0x1ee   :  { %v74_v49 = vrot.slane %v73_v48, 1 }
 0x1f0   :  { %v75_v50 = vadd.f32 %v74_v49, %v73_v48 }
 0x1f2   :  { %92 = vpush %v75_v50 }
 0x223   :  { %s93_s0 = spop %92 }
 0x224   :  { %78 = sst [smem:[#allocation2]] %s93_s0 }
 0x225   :  { %119 = shalt.err (!%p116_p2)
}
 0x226   :  { %s123_s23 = smov [#allocation2]  }
 0x227   :  { %86 = dma.smem_to_hbm %s123_s23, 16, %s165_s2, [#allocation3]  }
 0x228   :  { %120 = dma.done.wait [#allocation3], 16  }
 0x229   :  { %121 = vsyncadd [#allocation3], 4294967280 }
 0x22a   :  { %90 = sfence }
 0x22b   :  { %91 = vsyncpa [#allocation3], 1 }

</bundles_post_ra>
